<compile_context>
chip_gen: v7x
topology: tpu7x:2x2x1
jax: 0.10.0
libtpu: 0.0.40
codegen_flags: <defaults>
</compile_context>

<pallas_src>
import functools

import jax
import jax.numpy as jnp
from jax import lax
from jax.experimental import pallas as pl
from jax.experimental.pallas import tpu as pltpu


OUT_PAD = 128                       # lane-dense padded width for out_fc store
_LSTM_VMEM_LIMIT = 32 * 1024 * 1024  # safe on v5e/v6e/v7x
_LSTM_CHUNK_BUDGET = 8 * 1024 * 1024  # VMEM budget for double-buffered chunks
_MAX_ROW_TILE = 1024


# ---------------------------------------------------------------------------
# tiling / padding helpers
# ---------------------------------------------------------------------------
def _row_tiling(rows, max_tile=_MAX_ROW_TILE):
    """(row_tile, padded_rows). Single full block for small inputs, else
    fixed 1024-row tiles (multiple of 8) with zero padding."""
    if rows <= max_tile:
        return rows, rows
    rt = max_tile
    return rt, ((rows + rt - 1) // rt) * rt


def _pad_rows(a, rows_pad):
    rows = a.shape[0]
    if rows_pad == rows:
        return a
    return jnp.pad(a, ((0, rows_pad - rows),) + ((0, 0),) * (a.ndim - 1))


def _pick_time_chunk(s, b, h, budget=_LSTM_CHUNK_BUDGET, cap=1024):
    """Derive the LSTM time chunk from a VMEM byte budget:
    double-buffered gx inputs (2 x 8H) + double-buffered h outputs (2 x H)."""
    per_step = 4 * b * (2 * 2 * (8 * h) + 2 * 2 * h)   # bytes per time step
    tc = max(8, min(cap, budget // per_step))
    return max(1, min(s, tc))


# ---------------------------------------------------------------------------
# Pallas kernels
# ---------------------------------------------------------------------------
def _notefc_proj_kernel(x_ref, w1_ref, b1_ref, w2_ref, b2_ref, wih_ref, bih_ref,
                        o_ref):
    """note_fc (Linear-ReLU-[Dropout]-Linear-ReLU) fused with the layer-0
    bidirectional input projection.  Output (rows, 8H) is in the
    direction-interleaved gate layout (columns already permuted in wih/bih)."""
    h = jnp.dot(x_ref[...], w1_ref[...],
                preferred_element_type=jnp.float32) + b1_ref[...]
    h = jnp.maximum(h, 0.0)
    h = jnp.dot(h, w2_ref[...],
                preferred_element_type=jnp.float32) + b2_ref[...]
    h = jnp.maximum(h, 0.0)
    o_ref[...] = jnp.dot(h, wih_ref[...],
                         preferred_element_type=jnp.float32) + bih_ref[...]


def _mid_proj_kernel(hf_ref, hb_ref, wt_ref, wb_ref, b_ref, o_ref):
    """Input projection for LSTM layers > 0:
        gx = h_fwd @ wih[:H] + h_bwd @ wih[H:] + b   (interleaved gate columns)."""
    o_ref[...] = (jnp.dot(hf_ref[...], wt_ref[...],
                          preferred_element_type=jnp.float32)
                  + jnp.dot(hb_ref[...], wb_ref[...],
                            preferred_element_type=jnp.float32)
                  + b_ref[...])


def _outfc_kernel(hf_ref, hb_ref, w1t_ref, w1b_ref, b1_ref, w2_ref, b2_ref,
                  o_ref, *, out_col):
    """out_fc: Linear-ReLU-[Dropout]-Linear, sigmoid on last real channel.
    Output padded to OUT_PAD lanes (lane-dense store)."""
    h = (jnp.dot(hf_ref[...], w1t_ref[...], preferred_element_type=jnp.float32)
         + jnp.dot(hb_ref[...], w1b_ref[...], preferred_element_type=jnp.float32)
         + b1_ref[...])
    h = jnp.maximum(h, 0.0)
    y = jnp.dot(h, w2_ref[...], preferred_element_type=jnp.float32) + b2_ref[...]
    s = jax.nn.sigmoid(y[:, out_col:out_col + 1])                 # (rows, 1)
    col = lax.broadcasted_iota(jnp.int32, y.shape, 1)
    o_ref[...] = jnp.where(col == out_col, s, y)


def _bilstm_kernel(gxf_ref, gxb_ref, whh_ref, hf_ref, hb_ref, st_ref, *, H, TC):
    """Fused bidirectional LSTM recurrence over one time chunk.

    Gate columns are direction-interleaved: [i_f|i_b|f_f|f_b|g_f|g_b|o_f|o_b],
    so the carry is hc:(B,2H)=[h_f|h_b] and cc:(B,2H)=[c_f|c_b] and every cell
    elementwise op covers both directions at once.

    gxf_ref: (TC, B, 8H) precomputed input gates, natural time chunk j
    gxb_ref: (TC, B, 8H) same array, reversed chunk n-1-j (for the backward dir)
    whh_ref: (2H, 8H)    block-structured recurrent weights (interleaved cols)
    hf_ref : (TC, B, H)  forward hidden states (chunk j)
    hb_ref : (TC, B, H)  backward hidden states (chunk n-1-j, reversed in-chunk)
    st_ref : (2, B, 2H)  persistent [hc, cc] carry across chunks
    """
    @pl.when(pl.program_id(0) == 0)
    def _():
        st_ref[...] = jnp.zeros_like(st_ref)

    B = st_ref.shape[1]
    # Forward-direction lane mask (hoisted out of the loop).
    col = lax.broadcasted_iota(jnp.int32, (B, 8 * H), 1)
    is_fwd = (col % (2 * H)) < H

    def step(t, carry):
        hc, cc = carry                                            # (B, 2H) each
        # single recurrent matmul for both directions (N = 8H)
        rec = jnp.dot(hc, whh_ref[...], preferred_element_type=jnp.float32)
        # combine fwd gx (local t) with bwd gx (local TC-1-t): one wide select
        gx = jnp.where(is_fwd, gxf_ref[t], gxb_ref[TC - 1 - t])
        g = gx + rec                                              # (B, 8H)
        # two full-width EUP calls instead of 8 narrow ones
        sg = jax.nn.sigmoid(g)
        th = jnp.tanh(g)
        i_g = sg[:, 0 * H:2 * H]
        f_g = sg[:, 2 * H:4 * H]
        g_g = th[:, 4 * H:6 * H]
        o_g = sg[:, 6 * H:8 * H]
        cc = f_g * cc + i_g * g_g                                 # (B, 2H)
        hc = o_g * jnp.tanh(cc)                                   # (B, 2H)
        hf_ref[t] = hc[:, :H]
        hb_ref[TC - 1 - t] = hc[:, H:]
        return hc, cc

    hc, cc = lax.fori_loop(0, TC, step, (st_ref[0], st_ref[1]), unroll=4)
    st_ref[0] = hc
    st_ref[1] = cc


# ---------------------------------------------------------------------------
# pallas_call wrappers
# ---------------------------------------------------------------------------
def _run_notefc_proj(x2, w1, b1, w2, b2, wih, bih):
    n, d_in = x2.shape
    d_out = wih.shape[1]
    rt, n_pad = _row_tiling(n)
    x2p = _pad_rows(x2, n_pad)
    rm = lambda i: (i, 0)
    cm = lambda i: (0, 0)
    out = pl.pallas_call(
        _notefc_proj_kernel,
        grid=(n_pad // rt,),
        in_specs=[
            pl.BlockSpec((rt, d_in), rm),
            pl.BlockSpec(w1.shape, cm),
            pl.BlockSpec(b1.shape, cm),
            pl.BlockSpec(w2.shape, cm),
            pl.BlockSpec(b2.shape, cm),
            pl.BlockSpec(wih.shape, cm),
            pl.BlockSpec(bih.shape, cm),
        ],
        out_specs=pl.BlockSpec((rt, d_out), rm),
        out_shape=jax.ShapeDtypeStruct((n_pad, d_out), jnp.float32),
        compiler_params=pltpu.CompilerParams(
            dimension_semantics=("parallel",)),
    )(x2p, w1, b1, w2, b2, wih, bih)
    return out[:n] if n_pad != n else out


def _run_mid_proj(hf2, hb2, wt, wb, b):
    n, h = hf2.shape
    d_out = wt.shape[1]
    rt, n_pad = _row_tiling(n)
    hf2p = _pad_rows(hf2, n_pad)
    hb2p = _pad_rows(hb2, n_pad)
    rm = lambda i: (i, 0)
    cm = lambda i: (0, 0)
    out = pl.pallas_call(
        _mid_proj_kernel,
        grid=(n_pad // rt,),
        in_specs=[
            pl.BlockSpec((rt, h), rm),
            pl.BlockSpec((rt, h), rm),
            pl.BlockSpec(wt.shape, cm),
            pl.BlockSpec(wb.shape, cm),
            pl.BlockSpec(b.shape, cm),
        ],
        out_specs=pl.BlockSpec((rt, d_out), rm),
        out_shape=jax.ShapeDtypeStruct((n_pad, d_out), jnp.float32),
        compiler_params=pltpu.CompilerParams(
            dimension_semantics=("parallel",)),
    )(hf2p, hb2p, wt, wb, b)
    return out[:n] if n_pad != n else out


def _run_outfc(hf2, hb2, w1t, w1b, b1, w2p, b2p, out_col):
    n, h = hf2.shape
    rt, n_pad = _row_tiling(n)
    hf2p = _pad_rows(hf2, n_pad)
    hb2p = _pad_rows(hb2, n_pad)
    rm = lambda i: (i, 0)
    cm = lambda i: (0, 0)
    kern = functools.partial(_outfc_kernel, out_col=out_col)
    out = pl.pallas_call(
        kern,
        grid=(n_pad // rt,),
        in_specs=[
            pl.BlockSpec((rt, h), rm),
            pl.BlockSpec((rt, h), rm),
            pl.BlockSpec(w1t.shape, cm),
            pl.BlockSpec(w1b.shape, cm),
            pl.BlockSpec(b1.shape, cm),
            pl.BlockSpec(w2p.shape, cm),
            pl.BlockSpec(b2p.shape, cm),
        ],
        out_specs=pl.BlockSpec((rt, OUT_PAD), rm),
        out_shape=jax.ShapeDtypeStruct((n_pad, OUT_PAD), jnp.float32),
        compiler_params=pltpu.CompilerParams(
            dimension_semantics=("parallel",)),
    )(hf2p, hb2p, w1t, w1b, b1, w2p, b2p)
    return out[:n] if n_pad != n else out


def _run_bilstm(gx3, whh_i, h, time_chunk=None):
    """gx3: (S, B, 8H) precomputed input gates, direction-interleaved columns,
    natural time order.  Returns (h_fwd, h_bwd), each (S, B, H)."""
    s, b, _ = gx3.shape
    tc = _pick_time_chunk(s, b, h) if time_chunk is None else time_chunk
    tc = max(1, min(tc, s))
    s_pad = ((s + tc - 1) // tc) * tc
    if s_pad != s:
        # Zero padding at the END of time is exact: biases are folded into gx,
        # so gx==0 keeps the (zero-initialised) backward state exactly zero
        # through the padded steps; padded forward outputs are discarded.
        gx3 = jnp.pad(gx3, ((0, s_pad - s), (0, 0), (0, 0)))
    nchunks = s_pad // tc
    kern = functools.partial(_bilstm_kernel, H=h, TC=tc)
    hf, hb = pl.pallas_call(
        kern,
        grid=(nchunks,),
        in_specs=[
            # forward gates: natural chunk j
            pl.BlockSpec((tc, b, 8 * h), lambda j: (j, 0, 0)),
            # backward gates: reversed chunk n-1-j (same array, second stream)
            pl.BlockSpec((tc, b, 8 * h), lambda j: (nchunks - 1 - j, 0, 0)),
            pl.BlockSpec(whh_i.shape, lambda j: (0, 0)),
        ],
        out_specs=[
            pl.BlockSpec((tc, b, h), lambda j: (j, 0, 0)),
            pl.BlockSpec((tc, b, h), lambda j: (nchunks - 1 - j, 0, 0)),
        ],
        out_shape=[
            jax.ShapeDtypeStruct((s_pad, b, h), jnp.float32),
            jax.ShapeDtypeStruct((s_pad, b, h), jnp.float32),
        ],
        scratch_shapes=[pltpu.VMEM((2, b, 2 * h), jnp.float32)],
        compiler_params=pltpu.CompilerParams(
            dimension_semantics=("arbitrary",),
            vmem_limit_bytes=_LSTM_VMEM_LIMIT),
    )(gx3, gx3, whh_i)
    if s_pad != s:
        hf = hf[:s]
        hb = hb[:s]
    return hf, hb


# ---------------------------------------------------------------------------
# weight prep (once per call; in real use cache these)
# ---------------------------------------------------------------------------
# interleaved column-block order (source block in the old [fwd 4H | bwd 4H]
# layout for each new H-wide block): i_f,i_b,f_f,f_b,g_f,g_b,o_f,o_b
_BLOCK_PERM = (0, 4, 1, 5, 2, 6, 3, 7)


def _prep_lstm_layer(fwd, bwd, h):
    wih_f, whh_f, b_f = fwd           # (D_in,4H), (H,4H), (1,4H)
    wih_b, whh_b, b_b = bwd

    def interleave_cols(m_f, m_b):
        old = jnp.concatenate([m_f, m_b], axis=1)                   # (..., 8H)
        return jnp.concatenate(
            [old[:, s * h:(s + 1) * h] for s in _BLOCK_PERM], axis=1)

    wih_i = interleave_cols(wih_f, wih_b)                           # (D_in, 8H)
    b_i = interleave_cols(b_f, b_b)                                 # (1, 8H)
    whh_old = jnp.zeros((2 * h, 8 * h), jnp.float32)
    whh_old = whh_old.at[:h, :4 * h].set(whh_f)
    whh_old = whh_old.at[h:, 4 * h:].set(whh_b)
    whh_i = jnp.concatenate(
        [whh_old[:, s * h:(s + 1) * h] for s in _BLOCK_PERM], axis=1)
    return wih_i, b_i, whh_i


# ---------------------------------------------------------------------------
# forward
# ---------------------------------------------------------------------------
def trill_rnn_forward(x, params, time_chunk=None):
    """Pallas implementation of TrillRNN.forward (loss_type='MSE', eval mode)."""
    b, s, d_in = x.shape
    h = params["hidden"]
    out_size = params["output_size"]
    rows = s * b

    # single layout change in: batch-first -> time-major, rows flattened
    x2 = jnp.transpose(x, (1, 0, 2)).reshape(rows, d_in)

    layers = params["lstm_layers"]

    # layer 0: note_fc fused with the layer-0 input projection
    wih0, bih0, whh0 = _prep_lstm_layer(layers[0]["fwd"], layers[0]["bwd"], h)
    gx = _run_notefc_proj(x2,
                          params["note_fc_w1"], params["note_fc_b1"],
                          params["note_fc_w2"], params["note_fc_b2"],
                          wih0, bih0)                                # (rows, 8H)
    hf, hb = _run_bilstm(gx.reshape(s, b, 8 * h), whh0, h, time_chunk)

    # remaining bidirectional LSTM layers
    for layer in layers[1:]:
        wih, bih, whh = _prep_lstm_layer(layer["fwd"], layer["bwd"], h)
        gx = _run_mid_proj(hf.reshape(rows, h), hb.reshape(rows, h),
                           wih[:h], wih[h:], bih)                    # (rows, 8H)
        hf, hb = _run_bilstm(gx.reshape(s, b, 8 * h), whh, h, time_chunk)

    # out_fc with lane-dense padded output, sigmoid on last real channel
    w2p = jnp.zeros((h, OUT_PAD), jnp.float32).at[:, :out_size].set(
        params["out_fc_w2"])
    b2p = jnp.zeros((1, OUT_PAD), jnp.float32).at[:, :out_size].set(
        params["out_fc_b2"])
    w1 = params["out_fc_w1"]
    yp = _run_outfc(hf.reshape(rows, h), hb.reshape(rows, h),
                    w1[:h], w1[h:], params["out_fc_b1"], w2p, b2p,
                    out_col=out_size - 1)                            # (rows, 128)
    out = yp[:, :out_size].reshape(s, b, out_size)
    out = jnp.transpose(out, (1, 0, 2))                              # batch-first

    return out, False, False, jnp.zeros((1,), jnp.float32)


# ---------------------------------------------------------------------------
# deterministic synthetic parameters (no checkpoint load)
# ---------------------------------------------------------------------------
def init_params(key, input_size, hidden, output_size, num_layers):
    def uniform(k, shape, fan):
        bound = 1.0 / jnp.sqrt(jnp.float32(fan))
        return jax.random.uniform(k, shape, jnp.float32, -bound, bound)

    keys = iter(jax.random.split(key, 64))
    p = {"hidden": hidden, "output_size": output_size}

    # note_fc (stored pre-transposed: (D_in, D_out), bias (1, D_out))
    p["note_fc_w1"] = uniform(next(keys), (input_size, hidden), input_size)
    p["note_fc_b1"] = uniform(next(keys), (1, hidden), input_size)
    p["note_fc_w2"] = uniform(next(keys), (hidden, hidden), hidden)
    p["note_fc_b2"] = uniform(next(keys), (1, hidden), hidden)

    # bidirectional LSTM layers (gate order i, f, g, o as in PyTorch)
    layers = []
    for l in range(num_layers):
        d_in = hidden if l == 0 else 2 * hidden
        layer = {}
        for dname in ("fwd", "bwd"):
            wih = uniform(next(keys), (d_in, 4 * hidden), hidden)
            whh = uniform(next(keys), (hidden, 4 * hidden), hidden)
            bih = uniform(next(keys), (1, 4 * hidden), hidden)
            bhh = uniform(next(keys), (1, 4 * hidden), hidden)
            layer[dname] = (wih, whh, bih + bhh)
        layers.append(layer)
    p["lstm_layers"] = layers

    # out_fc
    p["out_fc_w1"] = uniform(next(keys), (2 * hidden, hidden), 2 * hidden)
    p["out_fc_b1"] = uniform(next(keys), (1, hidden), 2 * hidden)
    p["out_fc_w2"] = uniform(next(keys), (hidden, output_size), hidden)
    p["out_fc_b2"] = uniform(next(keys), (1, output_size), hidden)
    return p


# ---------------------------------------------------------------------------
# pure-JAX reference (same math) for a correctness sanity check
# ---------------------------------------------------------------------------
def _ref_forward(x, params):
    b, s, d_in = x.shape
    hidden = params["hidden"]

    h = jnp.maximum(x.reshape(b * s, d_in) @ params["note_fc_w1"]
                    + params["note_fc_b1"], 0.0)
    h = jnp.maximum(h @ params["note_fc_w2"] + params["note_fc_b2"], 0.0)
    h = h.reshape(b, s, hidden)

    def lstm_dir(x_tm, wih, whh, bias):
        def step(carry, x_t):
            hh, cc = carry
            g = x_t @ wih + hh @ whh + bias
            i_g = jax.nn.sigmoid(g[:, 0 * hidden:1 * hidden])
            f_g = jax.nn.sigmoid(g[:, 1 * hidden:2 * hidden])
            g_g = jnp.tanh(g[:, 2 * hidden:3 * hidden])
            o_g = jax.nn.sigmoid(g[:, 3 * hidden:4 * hidden])
            cc = f_g * cc + i_g * g_g
            hh = o_g * jnp.tanh(cc)
            return (hh, cc), hh
        init = (jnp.zeros((x_tm.shape[1], hidden)),
                jnp.zeros((x_tm.shape[1], hidden)))
        _, hs = lax.scan(step, init, x_tm)
        return hs

    for layer in params["lstm_layers"]:
        x_tm = jnp.transpose(h, (1, 0, 2))
        hf = lstm_dir(x_tm, *layer["fwd"])
        hb = lstm_dir(x_tm[::-1], *layer["bwd"])[::-1]
        h = jnp.transpose(jnp.concatenate([hf, hb], axis=-1), (1, 0, 2))

    o = jnp.maximum(h.reshape(b * s, 2 * hidden) @ params["out_fc_w1"]
                    + params["out_fc_b1"], 0.0)
    o = o @ params["out_fc_w2"] + params["out_fc_b2"]
    o = o.reshape(b, s, params["output_size"])
    o = o.at[:, :, -1].set(jax.nn.sigmoid(o[:, :, -1]))
    return o


# ---------------------------------------------------------------------------
if __name__ == "__main__":
    BATCH, SEQ = 2, 8
    INPUT_SIZE, HIDDEN, OUTPUT_SIZE, NUM_LAYERS = 16, 32, 4, 2

    key = jax.random.PRNGKey(0)
    k_x, k_p = jax.random.split(key)
    x = jax.random.normal(k_x, (BATCH, SEQ, INPUT_SIZE), jnp.float32)
    params = init_params(k_p, INPUT_SIZE, HIDDEN, OUTPUT_SIZE, NUM_LAYERS)

    # run once with an explicit small time chunk (exercises the multi-chunk,
    # reversed-block LSTM path) and once with the auto (VMEM-budget) chunk.
    out_a, _, _, aux = trill_rnn_forward(x, params, time_chunk=4)
    out_a = jax.block_until_ready(out_a)
    out_b, _, _, _ = trill_rnn_forward(x, params)
    out_b = jax.block_until_ready(out_b)

    ref = jax.block_until_ready(_ref_forward(x, params))
    assert out_a.shape == (BATCH, SEQ, OUTPUT_SIZE)
    assert jnp.allclose(out_a, ref, atol=1e-4, rtol=1e-4), "mismatch (chunked)"
    assert jnp.allclose(out_b, ref, atol=1e-4, rtol=1e-4), "mismatch (auto)"

    print("KERNEL_OK")
</pallas_src>

<mosaic_0001>
module attributes {stable_mosaic.version = 11 : i64} {
  func.func @_notefc_proj_kernel(%arg0: i32, %arg1: memref<16x16xf32, #tpu.memory_space<vmem>>, %arg2: memref<16x32xf32, #tpu.memory_space<vmem>>, %arg3: memref<1x32xf32, #tpu.memory_space<vmem>>, %arg4: memref<32x32xf32, #tpu.memory_space<vmem>>, %arg5: memref<1x32xf32, #tpu.memory_space<vmem>>, %arg6: memref<32x256xf32, #tpu.memory_space<vmem>>, %arg7: memref<1x256xf32, #tpu.memory_space<vmem>>, %arg8: memref<16x256xf32, #tpu.memory_space<vmem>>) attributes {dimension_semantics = [#tpu.dimension_semantics<parallel>], iteration_bounds = array<i64: 1>, scalar_prefetch = 0 : i64, scratch_operands = 0 : i64, tpu.core_type = #tpu.core_type<tc>, window_params = [{transform_indices = @transform_0, window_bounds = array<i64: 16, 16>}, {pipeline_mode = #tpu.pipeline_mode<synchronous>, transform_indices = @transform_1, window_bounds = array<i64: 16, 32>}, {pipeline_mode = #tpu.pipeline_mode<synchronous>, transform_indices = @transform_2, window_bounds = array<i64: 1, 32>}, {pipeline_mode = #tpu.pipeline_mode<synchronous>, transform_indices = @transform_3, window_bounds = array<i64: 32, 32>}, {pipeline_mode = #tpu.pipeline_mode<synchronous>, transform_indices = @transform_4, window_bounds = array<i64: 1, 32>}, {pipeline_mode = #tpu.pipeline_mode<synchronous>, transform_indices = @transform_5, window_bounds = array<i64: 32, 256>}, {pipeline_mode = #tpu.pipeline_mode<synchronous>, transform_indices = @transform_6, window_bounds = array<i64: 1, 256>}, {transform_indices = @transform_7, window_bounds = array<i64: 16, 256>}]} {
    %c0 = arith.constant 0 : index
    %c0_0 = arith.constant 0 : index
    %0 = vector.load %arg1[%c0, %c0_0] : memref<16x16xf32, #tpu.memory_space<vmem>>, vector<16x16xf32>
    %c0_1 = arith.constant 0 : index
    %c0_2 = arith.constant 0 : index
    %1 = vector.load %arg2[%c0_1, %c0_2] : memref<16x32xf32, #tpu.memory_space<vmem>>, vector<16x32xf32>
    %cst = arith.constant dense<0.000000e+00> : vector<16x32xf32>
    %2 = tpu.matmul %0, %1, %cst {dimension_numbers = #tpu.dot_dimension_numbers<[1], [0], [0], [1], [0, 0, 1, 1], [], []>} : vector<16x16xf32>, vector<16x32xf32>, vector<16x32xf32> -> vector<16x32xf32>
    %c0_3 = arith.constant 0 : index
    %c0_4 = arith.constant 0 : index
    %3 = vector.load %arg3[%c0_3, %c0_4] : memref<1x32xf32, #tpu.memory_space<vmem>>, vector<1x32xf32>
    %4 = vector.broadcast %3 : vector<1x32xf32> to vector<16x32xf32>
    %5 = arith.addf %2, %4 : vector<16x32xf32>
    %cst_5 = arith.constant 0.000000e+00 : f32
    %6 = vector.broadcast %cst_5 : f32 to vector<16x32xf32>
    %7 = arith.maximumf %5, %6 : vector<16x32xf32>
    %c0_6 = arith.constant 0 : index
    %c0_7 = arith.constant 0 : index
    %8 = vector.load %arg4[%c0_6, %c0_7] : memref<32x32xf32, #tpu.memory_space<vmem>>, vector<32x32xf32>
    %cst_8 = arith.constant dense<0.000000e+00> : vector<16x32xf32>
    %9 = tpu.matmul %7, %8, %cst_8 {dimension_numbers = #tpu.dot_dimension_numbers<[1], [0], [0], [1], [0, 0, 1, 1], [], []>} : vector<16x32xf32>, vector<32x32xf32>, vector<16x32xf32> -> vector<16x32xf32>
    %c0_9 = arith.constant 0 : index
    %c0_10 = arith.constant 0 : index
    %10 = vector.load %arg5[%c0_9, %c0_10] : memref<1x32xf32, #tpu.memory_space<vmem>>, vector<1x32xf32>
    %11 = vector.broadcast %10 : vector<1x32xf32> to vector<16x32xf32>
    %12 = arith.addf %9, %11 : vector<16x32xf32>
    %cst_11 = arith.constant 0.000000e+00 : f32
    %13 = vector.broadcast %cst_11 : f32 to vector<16x32xf32>
    %14 = arith.maximumf %12, %13 : vector<16x32xf32>
    %c0_12 = arith.constant 0 : index
    %c0_13 = arith.constant 0 : index
    %15 = vector.load %arg6[%c0_12, %c0_13] : memref<32x256xf32, #tpu.memory_space<vmem>>, vector<32x256xf32>
    %cst_14 = arith.constant dense<0.000000e+00> : vector<16x256xf32>
    %16 = tpu.matmul %14, %15, %cst_14 {dimension_numbers = #tpu.dot_dimension_numbers<[1], [0], [0], [1], [0, 0, 1, 1], [], []>} : vector<16x32xf32>, vector<32x256xf32>, vector<16x256xf32> -> vector<16x256xf32>
    %c0_15 = arith.constant 0 : index
    %c0_16 = arith.constant 0 : index
    %17 = vector.load %arg7[%c0_15, %c0_16] : memref<1x256xf32, #tpu.memory_space<vmem>>, vector<1x256xf32>
    %18 = vector.broadcast %17 : vector<1x256xf32> to vector<16x256xf32>
    %19 = arith.addf %16, %18 : vector<16x256xf32>
    %c0_17 = arith.constant 0 : index
    %c0_18 = arith.constant 0 : index
    %20 = vector.load %arg8[%c0_17, %c0_18] : memref<16x256xf32, #tpu.memory_space<vmem>>, vector<16x256xf32>
    tpu.vector_store %arg8[%c0_17, %c0_18], %19 {strides = array<i32>} : memref<16x256xf32, #tpu.memory_space<vmem>>, vector<16x256xf32>,
    return
  }
  func.func @transform_0(%arg0: i32) -> (i32, i32) {
    %c0_i32 = arith.constant 0 : i32
    %c0_i32_0 = arith.constant 0 : i32
    return %arg0, %c0_i32 : i32, i32
  }
  func.func @transform_1(%arg0: i32) -> (i32, i32) {
    %c0_i32 = arith.constant 0 : i32
    %c0_i32_0 = arith.constant 0 : i32
    %c0_i32_1 = arith.constant 0 : i32
    return %c0_i32, %c0_i32_0 : i32, i32
  }
  func.func @transform_2(%arg0: i32) -> (i32, i32) {
    %c0_i32 = arith.constant 0 : i32
    %c0_i32_0 = arith.constant 0 : i32
    %c0_i32_1 = arith.constant 0 : i32
    return %c0_i32, %c0_i32_0 : i32, i32
  }
  func.func @transform_3(%arg0: i32) -> (i32, i32) {
    %c0_i32 = arith.constant 0 : i32
    %c0_i32_0 = arith.constant 0 : i32
    %c0_i32_1 = arith.constant 0 : i32
    return %c0_i32, %c0_i32_0 : i32, i32
  }
  func.func @transform_4(%arg0: i32) -> (i32, i32) {
    %c0_i32 = arith.constant 0 : i32
    %c0_i32_0 = arith.constant 0 : i32
    %c0_i32_1 = arith.constant 0 : i32
    return %c0_i32, %c0_i32_0 : i32, i32
  }
  func.func @transform_5(%arg0: i32) -> (i32, i32) {
    %c0_i32 = arith.constant 0 : i32
    %c0_i32_0 = arith.constant 0 : i32
    %c0_i32_1 = arith.constant 0 : i32
    return %c0_i32, %c0_i32_0 : i32, i32
  }
  func.func @transform_6(%arg0: i32) -> (i32, i32) {
    %c0_i32 = arith.constant 0 : i32
    %c0_i32_0 = arith.constant 0 : i32
    %c0_i32_1 = arith.constant 0 : i32
    return %c0_i32, %c0_i32_0 : i32, i32
  }
  func.func @transform_7(%arg0: i32) -> (i32, i32) {
    %c0_i32 = arith.constant 0 : i32
    %c0_i32_0 = arith.constant 0 : i32
    return %arg0, %c0_i32 : i32, i32
  }
}

</mosaic_0001>

<bundles_post_ra>
// kernel: tpu_custom_call.1
= control target key start
LH: loop header
LB: loop body
LE: loop exit
PB: predicated region body
PF: predicated region fallthrough
CT: control target
= control target key end

     0   :  { %12 = vsyncpa [#allocation3], 0  ;;  %s734_s0 = inlined_call_operand.hbm [shape: f32[16,16], index: 0, kind: input, shape index: {}]   ;;  %s735_s1 = inlined_call_operand.hbm [shape: f32[16,32], index: 1, kind: input, shape index: {}]   ;;  %s736_s2 = inlined_call_operand.vmem [shape: f32[1,32], index: 2, kind: input, shape index: {}]   ;;  %s737_s3 = inlined_call_operand.hbm [shape: f32[32,32], index: 3, kind: input, shape index: {}]   ;;  %s738_s4 = inlined_call_operand.vmem [shape: f32[1,32], index: 4, kind: input, shape index: {}]   ;;  %s739_s5 = inlined_call_operand.hbm [shape: f32[32,256], index: 5, kind: input, shape index: {}]   ;;  %s740_s6 = inlined_call_operand.vmem [shape: f32[1,256], index: 6, kind: input, shape index: {}]   ;;  %s741_s7 = inlined_call_operand.hbm [shape: f32[16,256], index: 7, kind: output, shape index: {}]  }
   0x1   :  { %13 = vsyncpa [#allocation6], 0 }
   0x2   :  { %14 = vsyncpa [#allocation9], 0 }
   0x3   :  { %15 = vsyncpa [#allocation4], 0  ;;  %s582_s24 = smov [#allocation5]   ;;  %s583_s26 = smov [#allocation2]  }
   0x4   :  { %s33_s25 = sshll.u32 %s582_s24, 4  ;;  %s21_s27 = sshll.u32 %s583_s26, 4  ;;  %s34_s25 = int_to_ptr.vmem [resolvable:$true] %s33_s25  ;;  %s632_s27 = int_to_ptr.vmem [resolvable:$true] %s21_s27 }
   0x5   :  { %s464_s30 = scalar_lea.hbm %s735_s1, 256 }
   0x6   :  { %p465_p0 = scmp.ne.s32.totalorder %s735_s1, %s464_s30  ;;  %p468_p1 = scmp.lt.u32.totalorder %s464_s30, %s735_s1 }
   0x8   :  { %p470_p2 = pnand %p468_p1, %p465_p0 }
   0xa   :  { %473 = shalt.err (!%p470_p2)
}
   0xb   :  { %s474_s12 = scalar_lea.vmem %s34_s25, 256  ;;  %p479_p4 = scmp.lt.s32.totalorder %s34_s25, %s34_s25 }
   0xc   :  { %p475_p3 = scmp.ne.s32.totalorder %s34_s25, %s474_s12  ;;  %p480_p5 = scmp.lt.s32.totalorder %s474_s12, %s474_s12 }
   0xe   :  { %p481_p6 = por %p480_p5, %p479_p4 }
  0x10   :  { %p482_p7 = pnand %p481_p6, %p475_p3 }
  0x12   :  { %485 = shalt.err (!%p482_p7)
}
  0x13   :  { %s584_s13 = smov 128   ;;  %s585_s14 = smov 8  }
  0x14   :  { %39 = dma.hbm_to_vmem [thread:$0]  %s735_s1, 256, %s34_s25, [#allocation6], %s584_s13, %s584_s13, %s585_s14  }
  0x15   :  { %s486_s19 = scalar_lea.hbm %s734_s0, 256 }
  0x16   :  { %p487_p8 = scmp.ne.s32.totalorder %s734_s0, %s486_s19  ;;  %p490_p9 = scmp.lt.u32.totalorder %s486_s19, %s734_s0 }
  0x18   :  { %p492_p10 = pnand %p490_p9, %p487_p8 }
  0x1a   :  { %495 = shalt.err (!%p492_p10)
}
  0x1b   :  { %s496_s24 = scalar_lea.vmem %s632_s27, 256  ;;  %p501_p12 = scmp.lt.s32.totalorder %s632_s27, %s632_s27 }
  0x1c   :  { %p497_p11 = scmp.ne.s32.totalorder %s632_s27, %s496_s24  ;;  %p502_p13 = scmp.lt.s32.totalorder %s496_s24, %s496_s24 }
  0x1e   :  { %p503_p0 = por %p502_p13, %p501_p12 }
  0x20   :  { %p504_p1 = pnand %p503_p0, %p497_p11 }
  0x22   :  { %507 = shalt.err (!%p504_p1)
}
  0x23   :  { %27 = dma.hbm_to_vmem [thread:$0]  %s734_s0, 256, %s632_s27, [#allocation3], %s584_s13, %s584_s13, %s585_s14  }
  0x24   :  { %s586_s26 = smov [#allocation7]   ;;  %s587_s29 = smov [#allocation8]  }
  0x25   :  { %s47_s28 = sshll.u32 %s586_s26, 4  ;;  %s61_s30 = sshll.u32 %s587_s29, 4  ;;  %s48_s28 = int_to_ptr.vmem [resolvable:$true] %s47_s28  ;;  %s669_s30 = int_to_ptr.vmem [resolvable:$true] %s61_s30 }
  0x26   :  { %s508_s10 = scalar_lea.hbm %s737_s3, 512 }
  0x27   :  { %p509_p2 = scmp.ne.s32.totalorder %s737_s3, %s508_s10  ;;  %p512_p3 = scmp.lt.u32.totalorder %s508_s10, %s737_s3 }
  0x29   :  { %p514_p4 = pnand %p512_p3, %p509_p2 }
  0x2b   :  { %517 = shalt.err (!%p514_p4)
}
  0x2c   :  { %s518_s0 = scalar_lea.vmem %s48_s28, 512  ;;  %p523_p6 = scmp.lt.s32.totalorder %s48_s28, %s48_s28 }
  0x2d   :  { %p519_p5 = scmp.ne.s32.totalorder %s48_s28, %s518_s0  ;;  %p524_p7 = scmp.lt.s32.totalorder %s518_s0, %s518_s0 }
  0x2f   :  { %p525_p8 = por %p524_p7, %p523_p6 }
  0x31   :  { %p526_p9 = pnand %p525_p8, %p519_p5 }
  0x33   :  { %529 = shalt.err (!%p526_p9)
}
  0x34   :  { %53 = dma.hbm_to_vmem [thread:$0]  %s737_s3, 512, %s48_s28, [#allocation6], %s584_s13, %s584_s13, %s585_s14  }
  0x35   :  { %s530_s20 = scalar_lea.hbm %s739_s5, 1024 }
  0x36   :  { %p531_p10 = scmp.ne.s32.totalorder %s739_s5, %s530_s20  ;;  %p534_p11 = scmp.lt.u32.totalorder %s530_s20, %s739_s5 }
  0x38   :  { %p536_p12 = pnand %p534_p11, %p531_p10 }
  0x3a   :  { %539 = shalt.err (!%p536_p12)
}
  0x3b   :  { %s540_s1 = scalar_lea.vmem %s669_s30, 1024  ;;  %p545_p0 = scmp.lt.s32.totalorder %s669_s30, %s669_s30 }
  0x3c   :  { %p541_p13 = scmp.ne.s32.totalorder %s669_s30, %s540_s1  ;;  %p546_p1 = scmp.lt.s32.totalorder %s540_s1, %s540_s1 }
  0x3e   :  { %p547_p2 = por %p546_p1, %p545_p0 }
  0x40   :  { %p548_p3 = pnand %p547_p2, %p541_p13 }
  0x42   :  { %551 = shalt.err (!%p548_p3)
}
  0x43   :  { %s588_s3 = smov 256   ;;  %s589_s13 = smov 16  }
  0x44   :  { %67 = dma.hbm_to_vmem [thread:$0]  %s739_s5, 1024, %s669_s30, [#allocation9], %s588_s3, %s588_s3, %s589_s13  }
  0x45   :  { %574 = dma.done.wait [#allocation3], 256  }
  0x46   :  { %575 = vsyncadd [#allocation3], 4294967040 }
  0x47   :  { %576 = dma.done.wait [#allocation6], 768  }
  0x48   :  { %577 = vsyncadd [#allocation6], 4294966528 }
  0x49   :  { %578 = dma.done.wait [#allocation9], 1024  }
  0x4a   :  { %579 = vsyncadd [#allocation9], 4294966272  ;;  %vm93_vm0 = vcmask 130048   ;;  %v84_v0 = vld [vmem:[#allocation5] sm:$0xff]  ;;  %v85_v1 = vld [vmem:[#allocation5 + $0x8] sm:$0xff]  ;;  %vm188_vm1 = vcmask 261120   ;;  %v282_v38 = vlaneseq }
  0x4b   :  { %v82_v2 = vld [vmem:[#allocation2] sm:$0xff]  ;;  %v434_v3 = vpack.c.bf16 %v85_v1, %v84_v0  ;;  %v178_v5 = vld [vmem:[#allocation7 + $0x8] sm:$0xff]  ;;  %v179_v8 = vld [vmem:[#allocation7 + $0x10] sm:$0xff]  ;;  %v590_v30 = vmov 0.0  }
  0x4c   :  { %420 = vmatprep.mubr.msk.f32.mxu1 %vm93_vm0, %v82_v2  ;;  %v177_v4 = vld [vmem:[#allocation7] sm:$0xff]  ;;  %v83_v7 = vld [vmem:[#allocation2 + $0x8] sm:$0xff]  ;;  %v180_v9 = vld [vmem:[#allocation7 + $0x18] sm:$0xff]  ;;  %362 = vmatprep.mubr.f32.mxu0 %v590_v30  ;;  %v283_v39 = vshrl.u32 %v282_v38, 7 }
  0x4d   :  { %v438_v6 = vpack.c.bf16 %v178_v5, %v177_v4  ;;  %435 = vmatprep.subr.bf16.mxu1 %v434_v3  ;;  %v442_v10 = vpack.c.bf16 %v180_v9, %v179_v8  ;;  %v273_v11 = vld [vmem:[#allocation8 + $0x8] sm:$0xff]  ;;  %v275_v12 = vld [vmem:[#allocation8 + $0x18] sm:$0xff]  ;;  %v272_v13 = vld [vmem:[#allocation8] sm:$0xff] }
  0x4e   :  { %437 = vmatpush3.bf16.msra.mxu1 %v434_v3  ;;  %v446_v14 = vpack.c.bf16 %v275_v12, %v273_v11  ;;  %v274_v15 = vld [vmem:[#allocation8 + $0x10] sm:$0xff]  ;;  %v398_v17 = vld [vmem:[%s736_s2] ss:$0 sm:$0xff]  ;;  %v277_v24 = vld [vmem:[#allocation8 + $0x28] sm:$0xff]  ;;  %v284_v40 = vsub.s32 0, %v283_v39  ;;  %v288_v42 = vsub.s32 1, %v283_v39 }
  0x4f   :  { %439 = vmatprep.subr.bf16.mxu1 %v438_v6  ;;  %v448_v16 = vpack.c.bf16 %v274_v15, %v272_v13  ;;  %v279_v25 = vld [vmem:[#allocation8 + $0x38] sm:$0xff]  ;;  %v276_v27 = vld [vmem:[#allocation8 + $0x20] sm:$0xff]  ;;  %v278_v28 = vld [vmem:[#allocation8 + $0x30] sm:$0xff] }
  0x50   :  { %447 = vmatprep.subr.bf16.mxu0 %v446_v14  ;;  %v450_v26 = vpack.c.bf16 %v279_v25, %v277_v24  ;;  %v452_v29 = vpack.c.bf16 %v278_v28, %v276_v27  ;;  %v401_v31 = vld [vmem:[%s738_s4] ss:$0 sm:$0xff]  ;;  %s591_s4 = smov [#allocation10]  }
  0x51   :  { %421 = vmatmul.mubr.msk.f32.vlgmr.msra.gmra.mrb[0].mxu1 %vm93_vm0, %v83_v7  ;;  %449 = vmatpush1.bf16.msra.mxu0 %v448_v16  ;;  %v280_v41 = vld [vmem:[%s740_s6] sm:$0x3]  ;;  %s384_s8 = sshll.u32 %s591_s4, 4  ;;  %s385_s8 = int_to_ptr.vmem [resolvable:$true] %s384_s8 }
  0x52   :  { %441 = vmatpush3.bf16.msra.mxu1 %v438_v6  ;;  %451 = vmatprep.subr.bf16.mxu0 %v450_v26  ;;  %v285_v43 = vrot.slane %v280_v41, %v284_v40  ;;  %v289_v44 = vrot.slane %v280_v41, %v288_v42  ;;  %s552_s9 = scalar_lea.vmem %s385_s8, 512  ;;  %p557_p5 = scmp.lt.s32.totalorder %s385_s8, %s385_s8 }
  0x53   :  { %443 = vmatprep.subr.bf16.mxu1 %v442_v10  ;;  %p553_p4 = scmp.ne.s32.totalorder %s385_s8, %s552_s9  ;;  %p558_p6 = scmp.lt.s32.totalorder %s552_s9, %s552_s9 }
  0x55   :  { %453 = vmatpush1.bf16.msra.mxu0 %v452_v29  ;;  %p559_p7 = por %p558_p6, %p557_p5 }
  0x56   :  { %445 = vmatpush3.bf16.msra.mxu1 %v442_v10 }
  0x57   :  { %p560_p8 = pnand %p559_p7, %p553_p4 }
 0x124   :  { %v422_v18 = vpop.f32.mrb[0].mxu1 }
 0x125   :  { %v172_v19 = vadd.f32 %v422_v18, %v398_v17  ;;  %v166_v20 = vpop.f32.mrb[1].mxu1 }
 0x126   :  { %v167_v21 = vadd.f32 %v398_v17, %v166_v20 }
 0x127   :  { %v176_v23 = vmax.f32 %v172_v19, 0.0 }
 0x128   :  { %v175_v22 = vmax.f32 %v167_v21, 0.0 }
 0x12a   :  { %431 = vmatprep.mubr.msk.f32.mxu1 %vm188_vm1, %v175_v22 }
 0x12b   :  { %432 = vmatmul.mubr.msk.f32.vlgmr.msra.gmra.mrb[2].mxu1 %vm188_vm1, %v176_v23 }
 0x1fe   :  { %v433_v32 = vpop.f32.mrb[2].mxu1 }
 0x1ff   :  { %v261_v33 = vpop.f32.mrb[3].mxu1  ;;  %v267_v35 = vadd.f32 %v433_v32, %v401_v31 }
 0x200   :  { %v262_v34 = vadd.f32 %v401_v31, %v261_v33 }
 0x201   :  { %v271_v37 = vmax.f32 %v267_v35, 0.0 }
 0x202   :  { %v270_v36 = vmax.f32 %v262_v34, 0.0 }
 0x204   :  { %404 = vmatmul.mubr.msk.f32.vlgmr.msra.gmra.mrb[0].mxu0 %vm188_vm1, %v270_v36 }
 0x205   :  { %368 = vmatprep.mubr.f32.mxu0 %v590_v30 }
 0x208   :  { %405 = vmatmul.mubr.msk.f32.gmra.mrb[2].mxu0 %vm188_vm1, %v271_v37 }
 0x2d7   :  { %v364_v45 = vpop.f32.mrb[0].mxu0 }
 0x2d8   :  { %v365_v46 = vadd.f32 %v364_v45, %v285_v43  ;;  %v366_v47 = vpop.f32.mrb[1].mxu0 }
 0x2d9   :  { %v367_v48 = vadd.f32 %v366_v47, %v289_v44 }
 0x2da   :  { %375 = vst [vmem:[#allocation10] sm:$0xff] %v365_v46 }
 0x2db   :  { %376 = vst [vmem:[#allocation10 + $0x8] sm:$0xff] %v367_v48  ;;  %v370_v49 = vpop.f32.mrb[2].mxu0 }
 0x2dc   :  { %v371_v50 = vadd.f32 %v370_v49, %v285_v43  ;;  %v372_v51 = vpop.f32.mrb[3].mxu0 }
 0x2dd   :  { %v373_v52 = vadd.f32 %v372_v51, %v289_v44 }
 0x2de   :  { %377 = vst [vmem:[#allocation10 + $0x10] sm:$0xff] %v371_v50 }
 0x2df   :  { %378 = vst [vmem:[#allocation10 + $0x18] sm:$0xff] %v373_v52 }
 0x2e0   :  { %563 = shalt.err (!%p560_p8)
}
 0x2e1   :  { %s564_s11 = scalar_lea.hbm %s741_s7, 512 }
 0x2e2   :  { %p565_p9 = scmp.ne.s32.totalorder %s741_s7, %s564_s11  ;;  %p568_p10 = scmp.lt.u32.totalorder %s564_s11, %s741_s7 }
 0x2e4   :  { %p570_p11 = pnand %p568_p10, %p565_p9 }
 0x2e6   :  { %573 = shalt.err (!%p570_p11)
}
 0x2e7   :  { %390 = dma.vmem_to_hbm [thread:$0]  %s385_s8, 512, %s741_s7, [#allocation4], %s588_s3, %s588_s3, %s589_s13  }
 0x2e8   :  { %580 = dma.done.wait [#allocation4], 512  }
 0x2e9   :  { %581 = vsyncadd [#allocation4], 4294966784 }
 0x2ea   :  { %394 = vsyncpa [#allocation3], 1 }
 0x2eb   :  { %395 = vsyncpa [#allocation6], 1 }
 0x2ec   :  { %396 = vsyncpa [#allocation9], 1 }
 0x2ed   :  { %397 = vsyncpa [#allocation4], 1 }

</bundles_post_ra>
